<compile_context>
chip_gen: v7x
topology: tpu7x:2x2x1
jax: 0.10.0
libtpu: 0.0.40
codegen_flags: <defaults>
</compile_context>

<pallas_src>
import collections
import functools

import jax
import jax.numpy as jnp
from jax import lax
from jax.experimental import pallas as pl
from jax.experimental.pallas import tpu as pltpu


def _ce_kernel(ls_ref, le_ref, lab_ref, out_ref, acc_ref, *,
               batch, w_start, w_end, need_mask):
    """One (core-split, batch-tile) grid step; accumulates weighted NLL sum in SMEM.

    ls_ref : (TB, C)     logits_start tile (native dtype, bf16 stays bf16)
    le_ref : (TB, C)     logits_end tile
    lab_ref: (TB, 2)     int32, [:, 0] start labels, [:, 1] end labels
    out_ref: (1, 1, 1)   f32 partial sum for this core-split (VMEM block, resident)
    acc_ref: (1,)        f32 SMEM running accumulator (per core)
    """
    p = pl.program_id(0)            # core-split index ("parallel")
    i = pl.program_id(1)            # batch-tile index within the split ("arbitrary")
    steps = pl.num_programs(1)

    @pl.when(i == 0)
    def _init():
        acc_ref[0] = jnp.float32(0.0)

    tb, c = ls_ref.shape
    labels = lab_ref[...]                                      # (TB, 2) int32
    cols = lax.broadcasted_iota(jnp.int32, (tb, c), 1)         # class id per lane

    if need_mask:
        # UNclamped global tile id -> rows past `batch` (ragged tile or overshoot tile
        # from the core split) get an all-false mask and contribute exactly 0.
        g = p * steps + i
        rows = g * tb + lax.broadcasted_iota(jnp.int32, (tb, 1), 0)
        valid = rows < batch                                   # (TB, 1) bool

    def weighted_nll_sum(x_ref, lab_col, weight):
        x = x_ref[...]                                         # native dtype
        m1 = jnp.max(x, axis=1, keepdims=True)                 # exact in native dtype
        # Gather x[i, label_i] via one-hot select directly on the native-dtype tile.
        # (Out-of-range labels silently contribute 0, unlike PyTorch which errors.)
        picked = jnp.sum(jnp.where(cols == lab_col, x, 0.0),
                         axis=1, keepdims=True).astype(jnp.float32)
        # f32 only for the exp/sum/log path (accuracy); max & gather stayed native.
        xs = x.astype(jnp.float32) - m1.astype(jnp.float32)
        s1 = jnp.sum(jnp.exp(xs), axis=1, keepdims=True)       # (TB, 1)
        lse = m1.astype(jnp.float32) + jnp.log(s1)             # logsumexp(x) per row
        nll = lse - picked                                     # (TB, 1)
        if need_mask:
            nll = jnp.where(valid, nll, 0.0)                   # select: NaN can't leak
        return weight * jnp.sum(nll)

    acc_ref[0] += (weighted_nll_sum(ls_ref, labels[:, 0:1], w_start)
                   + weighted_nll_sum(le_ref, labels[:, 1:2], w_end))

    # Write-through the running partial every step (cheap scalar store); the output
    # block stays resident along the inner axis so the last write is what lands in HBM.
    out_ref[...] = jnp.full((1, 1, 1), acc_ref[0], dtype=jnp.float32)


def _cross_entropy_jax(logits_start, logits_end, labels):
    """Algebraic single-pass formula (== double log_softmax up to float eps)."""
    def one(x, lab):
        x = x.astype(jnp.float32)
        lse = jax.scipy.special.logsumexp(x, axis=1)
        picked = jnp.take_along_axis(x, lab[:, None], axis=1)[:, 0]
        return jnp.mean(lse - picked)
    labels = labels.astype(jnp.int32)
    return one(logits_start, labels[:, 0]) + one(logits_end, labels[:, 1]) / 2.0


def cross_entropy_pallas(logits_start, logits_end, labels, *,
                         block_rows=512, num_core_splits=None,
                         min_pallas_bytes=1 << 20):
    """loss = mean(nll_start) + mean(nll_end) / 2  (PyTorch precedence)."""
    B, C = logits_start.shape
    assert logits_end.shape == (B, C)
    assert labels.shape == (B, 2)
    labels = labels.astype(jnp.int32)
    itemsize = jnp.dtype(logits_start.dtype).itemsize

    # Small problems: a 1-step grid is dominated by launch/step overhead; XLA's fused
    # reduction wins. (Pass min_pallas_bytes=0 to force the Pallas path.)
    if 2 * B * C * itemsize < min_pallas_bytes:
        return _cross_entropy_jax(logits_start, logits_end, labels)

    # ---- batch-tile selection (VMEM-aware; v7x has only 64 MiB physical VMEM) ----
    def vmem_need(tb):
        logits_io = 2 * 2 * tb * C * itemsize        # 2 inputs x double buffer
        labels_io = 2 * tb * 128 * 4                 # lane-padded int32 label block
        temps = 4 * tb * C * 4                       # f32 intermediates in the body
        return logits_io + labels_io + temps + (1 << 20)

    budget = 40 << 20                                # fits v7x 64 MiB with headroom
    if B <= block_rows:
        tb = B                                       # single tile (block == full dims)
    else:
        assert block_rows % 8 == 0
        tb = block_rows
    while tb > 8 and vmem_need(tb) > budget:
        tb = max(8, ((tb // 2) + 7) // 8 * 8)

    total_tiles = -(-B // tb)

    # ---- core split: 2 TensorCores on v7x, single core elsewhere ----
    if num_core_splits is None:
        try:
            kind = jax.devices()[0].device_kind.lower()
        except Exception:
            kind = ""
        num_core_splits = 2 if "v7" in kind else 1
    n_splits = max(1, min(int(num_core_splits), total_tiles))
    steps = -(-total_tiles // n_splits)
    covered_rows = n_splits * steps * tb
    need_mask = covered_rows != B                    # ragged last tile or overshoot tiles
    last_tile = total_tiles - 1

    def tile_idx(p, i):
        # Clamp overshoot tiles (from the core split) in-bounds; their rows are masked.
        g = jnp.minimum(p * steps + i, last_tile)
        return (g, 0)

    kernel = functools.partial(
        _ce_kernel,
        batch=B,
        w_start=1.0 / B,     # reduction='mean' for the start head
        w_end=0.5 / B,       # ... + loss_end / 2.0  (original precedence)
        need_mask=need_mask,
    )

    cost = pl.CostEstimate(
        flops=8 * B * C,
        transcendentals=2 * B * C,
        bytes_accessed=2 * B * C * itemsize + B * 2 * 4 + n_splits * 4,
    )

    vmem_limit = int(min(48 << 20, max(vmem_need(tb), 16 << 20)))

    # TODO(synk): if C ever becomes vocab-sized, add a C grid axis with an online
    # (flash-style) max/LSE accumulator so the working set stays fixed on 64 MiB VMEM.
    out = pl.pallas_call(
        kernel,
        out_shape=jax.ShapeDtypeStruct((n_splits, 1, 1), jnp.float32),
        grid=(n_splits, steps),
        in_specs=[
            pl.BlockSpec((tb, C), tile_idx),
            pl.BlockSpec((tb, C), tile_idx),
            pl.BlockSpec((tb, 2), tile_idx),
        ],
        out_specs=pl.BlockSpec((1, 1, 1), lambda p, i: (p, 0, 0)),
        scratch_shapes=[pltpu.SMEM((1,), jnp.float32)],
        compiler_params=pltpu.CompilerParams(
            dimension_semantics=("parallel", "arbitrary"),
            vmem_limit_bytes=vmem_limit,
        ),
        cost_estimate=cost,
    )(logits_start, logits_end, labels)

    return jnp.sum(out)      # sum of pre-weighted per-core partials


def cross_entropy_ref(logits_start, logits_end, labels):
    """Pure-JAX reference with the literal double-log_softmax semantics."""
    def one(x, lab):
        a = jax.nn.log_softmax(x.astype(jnp.float32), axis=1)
        b = jax.nn.log_softmax(a, axis=1)            # F.cross_entropy's internal pass
        picked = jnp.take_along_axis(b, lab[:, None], axis=1)[:, 0]
        return jnp.mean(-picked)
    labels = labels.astype(jnp.int32)
    return one(logits_start, labels[:, 0]) + one(logits_end, labels[:, 1]) / 2.0


Outputs = collections.namedtuple("Outputs", ["logits_start", "logits_end"])


def cross_entropy(outputs, labels, **kw):
    """Mirrors CrossEntropy.forward(outputs, labels)."""
    return cross_entropy_pallas(outputs.logits_start, outputs.logits_end, labels, **kw)


if __name__ == "__main__":
    def check(name, got, want, rtol=1e-4, atol=1e-4):
        got = jax.block_until_ready(got)
        assert jnp.allclose(got, want, rtol=rtol, atol=atol), (name, got, want)

    # 1) Small demo shape (QA start/end logits over a sequence axis).
    key = jax.random.PRNGKey(0)
    k1, k2, k3 = jax.random.split(key, 3)
    B, SEQ = 4, 128
    ls = jax.random.normal(k1, (B, SEQ), dtype=jnp.float32)
    le = jax.random.normal(k2, (B, SEQ), dtype=jnp.float32)
    lab = jax.random.randint(k3, (B, 2), minval=0, maxval=SEQ, dtype=jnp.int32)
    outputs = Outputs(logits_start=ls, logits_end=le)
    ref = cross_entropy_ref(ls, le, lab)
    check("small-auto (JAX bypass)", cross_entropy(outputs, lab), ref)
    check("small-forced-pallas", cross_entropy(outputs, lab, min_pallas_bytes=0), ref)

    # 2) Multi-tile with a ragged (unpadded) last tile, f32.
    k4, k5, k6 = jax.random.split(jax.random.PRNGKey(0), 3)
    B2, SEQ2 = 136, 256
    ls2 = jax.random.normal(k4, (B2, SEQ2), dtype=jnp.float32)
    le2 = jax.random.normal(k5, (B2, SEQ2), dtype=jnp.float32)
    lab2 = jax.random.randint(k6, (B2, 2), minval=0, maxval=SEQ2, dtype=jnp.int32)
    ref2 = cross_entropy_ref(ls2, le2, lab2)
    check("multi-tile ragged",
          cross_entropy_pallas(ls2, le2, lab2, block_rows=64, min_pallas_bytes=0),
          ref2)

    # 3) bf16 logits stay bf16 in HBM and on the max/gather passes.
    ls2b, le2b = ls2.astype(jnp.bfloat16), le2.astype(jnp.bfloat16)
    ref2b = cross_entropy_ref(ls2b, le2b, lab2)
    check("bf16 multi-tile",
          cross_entropy_pallas(ls2b, le2b, lab2, block_rows=64, min_pallas_bytes=0),
          ref2b)

    # 4) Two-way core-split path (auto-selected on v7x; exercised here on any chip).
    check("core-split partials",
          cross_entropy_pallas(ls2, le2, lab2, block_rows=64, num_core_splits=2,
                               min_pallas_bytes=0),
          ref2)

    print("KERNEL_OK")
</pallas_src>

<mosaic_0001>
module attributes {stable_mosaic.version = 11 : i64} {
  func.func @_ce_kernel(%arg0: i32, %arg1: i32, %arg2: memref<4x128xf32, #tpu.memory_space<vmem>>, %arg3: memref<4x128xf32, #tpu.memory_space<vmem>>, %arg4: memref<4x2xi32, #tpu.memory_space<vmem>>, %arg5: memref<1x1x1xf32, #tpu.memory_space<vmem>>, %arg6: memref<1xf32, #tpu.memory_space<smem>>) attributes {dimension_semantics = [#tpu.dimension_semantics<parallel>, #tpu.dimension_semantics<arbitrary>], iteration_bounds = array<i64: 1, 1>, scalar_prefetch = 0 : i64, scratch_operands = 1 : i64, tpu.core_type = #tpu.core_type<tc>, window_params = [{transform_indices = @transform_0, window_bounds = array<i64: 4, 128>}, {transform_indices = @transform_1, window_bounds = array<i64: 4, 128>}, {transform_indices = @transform_2, window_bounds = array<i64: 4, 2>}, {transform_indices = @transform_3, window_bounds = array<i64: 1, 1, 1>}]} {
    %c0_i32 = arith.constant 0 : i32
    %0 = arith.cmpi eq, %arg1, %c0_i32 : i32
    %1 = arith.extui %0 : i1 to i32
    %c0_i32_0 = arith.constant 0 : i32
    %2 = arith.cmpi ne, %1, %c0_i32_0 : i32
    scf.if %2 {
      %cst_23 = arith.constant 0.000000e+00 : f32
      %c0_24 = arith.constant 0 : index
      %58 = memref.load %arg6[%c0_24] : memref<1xf32, #tpu.memory_space<smem>>
      memref.store %cst_23, %arg6[%c0_24] : memref<1xf32, #tpu.memory_space<smem>>
    } else {
    }
    %c0 = arith.constant 0 : index
    %c0_1 = arith.constant 0 : index
    %3 = vector.load %arg4[%c0, %c0_1] : memref<4x2xi32, #tpu.memory_space<vmem>>, vector<4x2xi32>
    %4 = tpu.iota {dimensions = array<i32: 1>} : vector<4x128xi32>
    %c0_2 = arith.constant 0 : index
    %5 = memref.load %arg6[%c0_2] : memref<1xf32, #tpu.memory_space<smem>>
    %6 = vector.extract_strided_slice %3 {offsets = [0, 0], sizes = [4, 1], strides = [1, 1]} : vector<4x2xi32> to vector<4x1xi32>
    %c0_3 = arith.constant 0 : index
    %c0_4 = arith.constant 0 : index
    %7 = vector.load %arg2[%c0_3, %c0_4] : memref<4x128xf32, #tpu.memory_space<vmem>>, vector<4x128xf32>
    %cst = arith.constant dense<0xFF800000> : vector<4xf32>
    %8 = vector.multi_reduction <maximumf>, %7, %cst [1] : vector<4x128xf32> to vector<4xf32>
    %9 = vector.shape_cast %8 : vector<4xf32> to vector<4x1xf32>
    %10 = vector.broadcast %6 : vector<4x1xi32> to vector<4x128xi32>
    %11 = arith.cmpi eq, %4, %10 : vector<4x128xi32>
    %cst_5 = arith.constant 0.000000e+00 : f32
    %12 = vector.broadcast %cst_5 : f32 to vector<4x128xf32>
    %13 = arith.select %11, %7, %12 : vector<4x128xi1>, vector<4x128xf32>
    %cst_6 = arith.constant dense<0.000000e+00> : vector<4xf32>
    %14 = vector.multi_reduction <add>, %13, %cst_6 [1] : vector<4x128xf32> to vector<4xf32>
    %15 = vector.shape_cast %14 : vector<4xf32> to vector<4x1xf32>
    %16 = vector.broadcast %9 : vector<4x1xf32> to vector<4x128xf32>
    %17 = arith.subf %7, %16 : vector<4x128xf32>
    %18 = math.exp %17 : vector<4x128xf32>
    %cst_7 = arith.constant dense<0.000000e+00> : vector<4xf32>
    %19 = vector.multi_reduction <add>, %18, %cst_7 [1] : vector<4x128xf32> to vector<4xf32>
    %20 = vector.shape_cast %19 : vector<4xf32> to vector<4x1xf32>
    %21 = math.log %20 : vector<4x1xf32>
    %22 = arith.addf %9, %21 : vector<4x1xf32>
    %23 = arith.subf %22, %15 : vector<4x1xf32>
    %24 = vector.shape_cast %23 : vector<4x1xf32> to vector<1x4x1xf32>
    %cst_8 = arith.constant dense<0.000000e+00> : vector<1xf32>
    %25 = vector.multi_reduction <add>, %24, %cst_8 [1, 2] : vector<1x4x1xf32> to vector<1xf32>
    %26 = vector.shape_cast %25 : vector<1xf32> to vector<1x1x1xf32>
    %27 = vector.extract %26[0, 0, 0] : f32 from vector<1x1x1xf32>
    %cst_9 = arith.constant 2.500000e-01 : f32
    %28 = arith.mulf %cst_9, %27 : f32
    %29 = vector.extract_strided_slice %3 {offsets = [0, 1], sizes = [4, 1], strides = [1, 1]} : vector<4x2xi32> to vector<4x1xi32>
    %c0_10 = arith.constant 0 : index
    %c0_11 = arith.constant 0 : index
    %30 = vector.load %arg3[%c0_10, %c0_11] : memref<4x128xf32, #tpu.memory_space<vmem>>, vector<4x128xf32>
    %cst_12 = arith.constant dense<0xFF800000> : vector<4xf32>
    %31 = vector.multi_reduction <maximumf>, %30, %cst_12 [1] : vector<4x128xf32> to vector<4xf32>
    %32 = vector.shape_cast %31 : vector<4xf32> to vector<4x1xf32>
    %33 = vector.broadcast %29 : vector<4x1xi32> to vector<4x128xi32>
    %34 = arith.cmpi eq, %4, %33 : vector<4x128xi32>
    %cst_13 = arith.constant 0.000000e+00 : f32
    %35 = vector.broadcast %cst_13 : f32 to vector<4x128xf32>
    %36 = arith.select %34, %30, %35 : vector<4x128xi1>, vector<4x128xf32>
    %cst_14 = arith.constant dense<0.000000e+00> : vector<4xf32>
    %37 = vector.multi_reduction <add>, %36, %cst_14 [1] : vector<4x128xf32> to vector<4xf32>
    %38 = vector.shape_cast %37 : vector<4xf32> to vector<4x1xf32>
    %39 = vector.broadcast %32 : vector<4x1xf32> to vector<4x128xf32>
    %40 = arith.subf %30, %39 : vector<4x128xf32>
    %41 = math.exp %40 : vector<4x128xf32>
    %cst_15 = arith.constant dense<0.000000e+00> : vector<4xf32>
    %42 = vector.multi_reduction <add>, %41, %cst_15 [1] : vector<4x128xf32> to vector<4xf32>
    %43 = vector.shape_cast %42 : vector<4xf32> to vector<4x1xf32>
    %44 = math.log %43 : vector<4x1xf32>
    %45 = arith.addf %32, %44 : vector<4x1xf32>
    %46 = arith.subf %45, %38 : vector<4x1xf32>
    %47 = vector.shape_cast %46 : vector<4x1xf32> to vector<1x4x1xf32>
    %cst_16 = arith.constant dense<0.000000e+00> : vector<1xf32>
    %48 = vector.multi_reduction <add>, %47, %cst_16 [1, 2] : vector<1x4x1xf32> to vector<1xf32>
    %49 = vector.shape_cast %48 : vector<1xf32> to vector<1x1x1xf32>
    %50 = vector.extract %49[0, 0, 0] : f32 from vector<1x1x1xf32>
    %cst_17 = arith.constant 1.250000e-01 : f32
    %51 = arith.mulf %cst_17, %50 : f32
    %52 = arith.addf %28, %51 : f32
    %53 = arith.addf %5, %52 : f32
    %c0_18 = arith.constant 0 : index
    %54 = memref.load %arg6[%c0_18] : memref<1xf32, #tpu.memory_space<smem>>
    memref.store %53, %arg6[%c0_18] : memref<1xf32, #tpu.memory_space<smem>>
    %c0_19 = arith.constant 0 : index
    %55 = memref.load %arg6[%c0_19] : memref<1xf32, #tpu.memory_space<smem>>
    %56 = vector.broadcast %55 : f32 to vector<1x1x1xf32>
    %c0_20 = arith.constant 0 : index
    %c0_21 = arith.constant 0 : index
    %c0_22 = arith.constant 0 : index
    %57 = vector.load %arg5[%c0_20, %c0_21, %c0_22] : memref<1x1x1xf32, #tpu.memory_space<vmem>>, vector<1x1x1xf32>
    tpu.vector_store %arg5[%c0_20, %c0_21, %c0_22], %56 {strides = array<i32>} : memref<1x1x1xf32, #tpu.memory_space<vmem>>, vector<1x1x1xf32>,
    return
  }
  func.func @transform_0(%arg0: i32, %arg1: i32) -> (i32, i32) {
    %c1_i32 = arith.constant 1 : i32
    %0 = arith.muli %arg0, %c1_i32 : i32
    %1 = arith.addi %0, %arg1 : i32
    %c0_i32 = arith.constant 0 : i32
    %2 = arith.minsi %1, %c0_i32 : i32
    %c0_i32_0 = arith.constant 0 : i32
    %c0_i32_1 = arith.constant 0 : i32
    return %2, %c0_i32_0 : i32, i32
  }
  func.func @transform_1(%arg0: i32, %arg1: i32) -> (i32, i32) {
    %c1_i32 = arith.constant 1 : i32
    %0 = arith.muli %arg0, %c1_i32 : i32
    %1 = arith.addi %0, %arg1 : i32
    %c0_i32 = arith.constant 0 : i32
    %2 = arith.minsi %1, %c0_i32 : i32
    %c0_i32_0 = arith.constant 0 : i32
    %c0_i32_1 = arith.constant 0 : i32
    return %2, %c0_i32_0 : i32, i32
  }
  func.func @transform_2(%arg0: i32, %arg1: i32) -> (i32, i32) {
    %c1_i32 = arith.constant 1 : i32
    %0 = arith.muli %arg0, %c1_i32 : i32
    %1 = arith.addi %0, %arg1 : i32
    %c0_i32 = arith.constant 0 : i32
    %2 = arith.minsi %1, %c0_i32 : i32
    %c0_i32_0 = arith.constant 0 : i32
    %c0_i32_1 = arith.constant 0 : i32
    return %2, %c0_i32_0 : i32, i32
  }
  func.func @transform_3(%arg0: i32, %arg1: i32) -> (i32, i32, i32) {
    %c0_i32 = arith.constant 0 : i32
    %c0_i32_0 = arith.constant 0 : i32
    %c0_i32_1 = arith.constant 0 : i32
    return %arg0, %c0_i32, %c0_i32_0 : i32, i32, i32
  }
}

</mosaic_0001>

<bundles_post_ra>
// kernel: tpu_custom_call.1
= control target key start
LH: loop header
LB: loop body
LE: loop exit
PB: predicated region body
PF: predicated region fallthrough
CT: control target
= control target key end

     0   :  { %vm107_vm0 = vcmask 1043456   ;;  %v256_v3 = vmov 0   ;;  %s306_s0 = inlined_call_operand.vmem [shape: f32[4,128], index: 0, kind: input, shape index: {}]   ;;  %s307_s1 = inlined_call_operand.vmem [shape: f32[4,128], index: 1, kind: input, shape index: {}]   ;;  %s308_s2 = inlined_call_operand.vmem [shape: s32[4,2], index: 2, kind: input, shape index: {}]   ;;  %s309_s3 = inlined_call_operand.hbm [shape: f32[1,1,1], index: 3, kind: output, shape index: {}]  }
   0x1   :  { %v106_v0 = vld [vmem:[%s306_s0] sm:$0xf]  ;;  %221 = vset.pattern.permute.xlu1 %v256_v3 }
   0x2   :  { %v141_v1 = vld [vmem:[%s307_s1] sm:$0xf]  ;;  %v108_v2 = vsel %vm107_vm0, %v106_v0, -inf }
   0x3   :  { %v102_v4 = vld [vmem:[%s308_s2] sm:$0xf]  ;;  %109 = vmax.xlane.f32.xlu0 %v108_v2 }
   0x4   :  { %112 = vperm.xlu1 %221, %v102_v4  }
   0x5   :  { %8 = vsyncpa [#allocation4], 0  ;;  %v142_v5 = vsel %vm107_vm0, %v141_v1, -inf  ;;  %v257_v6 = vmov 1   ;;  %v103_v11 = vlaneseq  ;;  %vm129_vm3 = vcmask 3072   ;;  %s258_s19 = smov [#allocation3]  }
   0x6   :  { %223 = vset.pattern.permute.xlu0 %v257_v6  ;;  %s188_s20 = sshll.u32 %s258_s19, 4  ;;  %vm180_vm4 = vcmask 0   ;;  %s189_s20 = int_to_ptr.vmem [resolvable:$true] %s188_s20 }
   0x7   :  { %143 = vmax.xlane.f32.xlu0 %v142_v5  ;;  %v104_v15 = vand.u32 127, %v103_v11  ;;  %s232_s22 = scalar_lea.vmem %s189_s20, 16  ;;  %s236_s23 = scalar_lea.vmem %s189_s20, 32 }
   0x8   :  { %222 = vset.pattern.permute.xlu1 %v257_v6  ;;  %p233_p0 = scmp.ne.s32.totalorder %s189_s20, %s232_s22  ;;  %p237_p1 = scmp.lt.s32.totalorder %s189_s20, %s189_s20 }
   0x9   :  { %146 = vperm.xlu1 %222, %v102_v4   ;;  %p238_p2 = scmp.lt.s32.totalorder %s236_s23, %s232_s22 }
   0xb   :  { %p239_p3 = por %p238_p2, %p237_p1 }
   0xd   :  { %p240_p4 = pnand %p239_p3, %p233_p0 }
  0x83   :  { %v113_v14 = vpop.permute.xlu1 %112 }
  0x84   :  { %vm114_vm1 = vcmp.eq.s32.totalorder %v104_v15, %v113_v14 }
  0x85   :  { %v115_v18 = vsel %vm114_vm1, %v106_v0, 0.0 }
  0x86   :  { %v116_v20 = vsel %vm107_vm0, %v115_v18, 0.0 }
  0x88   :  { %v147_v16 = vpop.permute.xlu1 %146 }
  0x89   :  { %vm148_vm2 = vcmp.eq.s32.totalorder %v104_v15, %v147_v16 }
  0x8a   :  { %v149_v22 = vsel %vm148_vm2, %v141_v1, 0.0 }
  0x8b   :  { %v150_v24 = vsel %vm107_vm0, %v149_v22, 0.0 }
  0x90   :  { %v110_v7 = vpop.xlane.xlu0 %109 }
  0x91   :  { %v119_v8 = vsub.f32 %v106_v0, %v110_v7 }
  0x93   :  { %v120_v9 = vmul.f32 1.442695, %v119_v8 }
  0x94   :  { %v144_v10 = vpop.xlane.xlu0 %143 }
  0x95   :  { %224 = vpow2.f32 %v120_v9  ;;  %v153_v12 = vsub.f32 %v141_v1, %v144_v10 }
  0x97   :  { %v154_v13 = vmul.f32 1.442695, %v153_v12 }
  0x99   :  { %226 = vpow2.f32 %v154_v13 }
  0x9f   :  { %v225_v17 = vpop.eup %224 }
  0xa0   :  { %v122_v19 = vsel %vm107_vm0, %v225_v17, 0.0 }
  0xa1   :  { %123 = vadd.xlane.f32.xlu0 %v122_v19 }
  0xa3   :  { %v227_v21 = vpop.eup %226 }
  0xa4   :  { %v156_v23 = vsel %vm107_vm0, %v227_v21, 0.0 }
  0xa5   :  { %157 = vadd.xlane.f32.xlu1 %v156_v23  ;;  %117 = vadd.xlane.f32.xlu0 %v116_v20 }
  0xa9   :  { %151 = vadd.xlane.f32.xlu0 %v150_v24 }
 0x12e   :  { %v124_v25 = vpop.xlane.xlu0 %123 }
 0x12f   :  { %228 = vlog2.f32 %v124_v25 }
 0x132   :  { %v158_v26 = vpop.xlane.xlu1 %157  ;;  %v118_v28 = vpop.xlane.xlu0 %117 }
 0x133   :  { %230 = vlog2.f32 %v158_v26 }
 0x136   :  { %v152_v34 = vpop.xlane.xlu0 %151 }
 0x139   :  { %v229_v27 = vpop.eup %228 }
 0x13a   :  { %v126_v29 = vmul.f32 0.6931472, %v229_v27 }
 0x13c   :  { %v127_v30 = vadd.f32 %v126_v29, %v110_v7 }
 0x13d   :  { %v231_v31 = vpop.eup %230 }
 0x13e   :  { %v160_v32 = vmul.f32 0.6931472, %v231_v31  ;;  %v128_v33 = vsub.f32 %v127_v30, %v118_v28 }
 0x140   :  { %v130_v35 = vsel %vm129_vm3, %v128_v33, 0.0  ;;  %v161_v36 = vadd.f32 %v160_v32, %v144_v10 }
 0x141   :  { %131 = vadd.xlane.f32.xlu0 %v130_v35 }
 0x142   :  { %v162_v37 = vsub.f32 %v161_v36, %v152_v34 }
 0x144   :  { %v163_v38 = vsel %vm129_vm3, %v162_v37, 0.0 }
 0x145   :  { %164 = vadd.xlane.f32.xlu0 %v163_v38 }
 0x1ce   :  { %v132_v39 = vpop.xlane.xlu0 %131 }
 0x1cf   :  { %v133_v40 = vrot.slane %v132_v39, 4 }
 0x1d1   :  { %v134_v41 = vadd.f32 %v133_v40, %v132_v39 }
 0x1d2   :  { %v165_v42 = vpop.xlane.xlu0 %164 }
 0x1d3   :  { %v135_v43 = vrot.slane %v134_v41, 2  ;;  %v166_v44 = vrot.slane %v165_v42, 4 }
 0x1d5   :  { %v167_v45 = vadd.f32 %v166_v44, %v165_v42  ;;  %v136_v46 = vadd.f32 %v135_v43, %v134_v41 }
 0x1d7   :  { %v168_v47 = vrot.slane %v167_v45, 2  ;;  %v137_v48 = vrot.slane %v136_v46, 1 }
 0x1d9   :  { %v169_v49 = vadd.f32 %v168_v47, %v167_v45  ;;  %v138_v50 = vadd.f32 %v137_v48, %v136_v46 }
 0x1db   :  { %214 = vpush %v138_v50  ;;  %v170_v51 = vrot.slane %v169_v49, 1 }
 0x1dd   :  { %v171_v52 = vadd.f32 %v170_v51, %v169_v49 }
 0x1df   :  { %216 = vpush %v171_v52 }
 0x20c   :  { %s215_s0 = spop %214 }
 0x20d   :  { %s140_s1 = smul.f32 0.25, %s215_s0 }
 0x210   :  { %s217_s2 = spop %216 }
 0x211   :  { %s173_s18 = smul.f32 0.125, %s217_s2 }
 0x213   :  { %s174_s21 = sadd.f32 %s173_s18, %s140_s1 }
 0x215   :  { %v179_v53 = vstv %s174_s21 }
 0x216   :  { %181 = vst.msk [vmem:[#allocation3] sm:$0x1] %vm180_vm4, %v179_v53 }
 0x217   :  { %243 = shalt.err (!%p240_p4)
}
 0x218   :  { %s244_s26 = scalar_lea.hbm %s309_s3, 16 }
 0x219   :  { %p245_p5 = scmp.ne.s32.totalorder %s309_s3, %s244_s26  ;;  %p248_p6 = scmp.lt.u32.totalorder %s244_s26, %s309_s3 }
 0x21b   :  { %p250_p7 = pnand %p248_p6, %p245_p5 }
 0x21d   :  { %253 = shalt.err (!%p250_p7)
}
 0x21e   :  { %191 = dma.vmem_to_hbm [thread:$0]  %s189_s20, 16, %s309_s3, [#allocation4]  }
 0x21f   :  { %254 = dma.done.wait [#allocation4], 16  }
 0x220   :  { %255 = vsyncadd [#allocation4], 4294967280 }
 0x221   :  { %195 = vsyncpa [#allocation4], 1 }

</bundles_post_ra>
